<compile_context>
chip_gen: v7x
topology: tpu7x:2x2x1
jax: 0.10.0
libtpu: 0.0.40
codegen_flags: <defaults>
</compile_context>

<pallas_src>
import functools

import jax
import jax.numpy as jnp
from jax import lax
from jax.experimental import pallas as pl
from jax.experimental.pallas import tpu as pltpu

_INV_SQRT2 = 0.7071067811865476


def _round_up(x, m):
    return ((x + m - 1) // m) * m


def _pick_ff_tile(ff_dim, target):
    """Largest multiple of 128 that divides ff_dim and is <= target, else full ff_dim."""
    if ff_dim <= target:
        return ff_dim
    t = (target // 128) * 128
    while t >= 128:
        if ff_dim % t == 0:
            return t
        t -= 128
    return ff_dim


def ff_kernel(x_ref, gamma_ref, beta_ref, w1_ref, b1_ref, w2_ref, b2_ref,
              o_ref, *scratch, acc_in_out):
    """Grid = (row_tiles, ff_tiles). One row tile is reduced across the FF axis."""
    if acc_in_out:
        (y_ref,) = scratch      # f32 output: accumulate straight into o_ref (resident)
        acc_ref = o_ref
    else:
        y_ref, acc_ref = scratch

    k = pl.program_id(1)
    nk = pl.num_programs(1)

    # First FF slice for this row tile: LayerNorm once, zero the accumulator.
    @pl.when(k == 0)
    def _():
        x = x_ref[...].astype(jnp.float32)                      # (TM, D)
        mean = jnp.mean(x, axis=-1, keepdims=True)
        var = jnp.mean(jnp.square(x - mean), axis=-1, keepdims=True)
        xhat = (x - mean) * lax.rsqrt(var + jnp.float32(1e-5))
        ln = (xhat * gamma_ref[...].astype(jnp.float32)
              + beta_ref[...].astype(jnp.float32))
        y_ref[...] = ln.astype(y_ref.dtype)                     # stored in matmul dtype
        acc_ref[...] = jnp.zeros_like(acc_ref)

    # fc slice: (TM, D) @ (D, TFF) + b1[tff]    (f32 accumulation on the MXU)
    w1 = w1_ref[...]
    h = jnp.dot(y_ref[...], w1, preferred_element_type=jnp.float32)
    h = h + b1_ref[...].astype(jnp.float32)

    # exact GELU (erf form, matches nn.GELU() default), kept in f32
    h = 0.5 * h * (1.0 + lax.erf(h * _INV_SQRT2))

    # TODO(synk): dropout (p=0.1) treated as identity (inference / eval mode);
    # training-mode dropout would use pltpu.prng_seed + pltpu.stateful_bernoulli.

    # fc2 slice: accumulate (TM, TFF) @ (TFF, D)
    w2 = w2_ref[...]
    acc_ref[...] += jnp.dot(h.astype(w2.dtype), w2,
                            preferred_element_type=jnp.float32).astype(acc_ref.dtype)

    # Last FF slice: add output bias, write the row tile.
    @pl.when(k == nk - 1)
    def _():
        o_ref[...] = (acc_ref[...].astype(jnp.float32)
                      + b2_ref[...].astype(jnp.float32)).astype(o_ref.dtype)


@functools.partial(jax.jit, static_argnames=("tile_rows", "tile_ff"))
def ff_forward(x, gamma, beta, w1, b1, w2, b2, *, tile_rows=None, tile_ff=None):
    """x: (B, S, D) -> (B, S, D)."""
    B, S, D = x.shape
    FF = w1.shape[1]
    N = B * S
    x2 = x.reshape(N, D)

    xsz = jnp.dtype(x.dtype).itemsize
    wsz = jnp.dtype(w1.dtype).itemsize
    osz = xsz
    y_dtype = w1.dtype                       # LN scratch in the matmul input dtype
    ysz = jnp.dtype(y_dtype).itemsize
    acc_in_out = jnp.dtype(x.dtype) == jnp.dtype(jnp.float32)

    # --- per-generation tiling defaults / VMEM budget -----------------------
    try:
        kind = jax.devices()[0].device_kind.lower()
    except Exception:
        kind = ""
    big_vmem = any(t in kind for t in ("v4", "v5", "v6"))      # 128 MiB VMEM chips
    if big_vmem:
        vmem_budget, vmem_cap = 88 << 20, 110 << 20
        tm_target, tff_target = 2048, 2048
    else:                                                      # v7x (64 MiB/TC) or unknown
        vmem_budget, vmem_cap = 44 << 20, 58 << 20
        tm_target, tff_target = 1024, 1024

    sublane = {4: 8, 2: 16, 1: 32}.get(xsz, 8)
    tm = tm_target if tile_rows is None else tile_rows
    tm = _round_up(min(tm, _round_up(N, sublane)), sublane)
    tff = _pick_ff_tile(FF, tff_target) if tile_ff is None else tile_ff
    assert FF % tff == 0

    def need(tm_, tff_):
        return (2 * tm_ * D * xsz            # x block (double-buffered)
                + 2 * tm_ * D * osz          # out block (double-buffered)
                + 2 * D * tff_ * wsz         # w1 block
                + 2 * tff_ * D * wsz         # w2 block
                + 2 * (3 * D + tff_) * 4     # gamma / beta / b2 / b1 blocks
                + tm_ * D * ysz              # LN scratch
                + (0 if acc_in_out else tm_ * D * 4))   # f32 accumulator scratch

    # Shrink tiles to fit the budget (FF tile first: keeping the row tile large
    # minimizes weight re-streaming from HBM, which dominates at realistic sizes).
    while need(tm, tff) > vmem_budget:
        if tff > 256:
            cand = _pick_ff_tile(FF, tff // 2)
            if cand < tff:
                tff = cand
                continue
        if tm > 2 * sublane:
            tm = _round_up(tm // 2, sublane)
            continue
        break

    n_row_tiles = pl.cdiv(N, tm)             # partial final row block, no host padding
    grid = (n_row_tiles, FF // tff)

    vmem_limit = int(min(max(int(need(tm, tff) * 1.25) + (2 << 20), 8 << 20), vmem_cap))

    cost = pl.CostEstimate(
        flops=4 * N * D * FF + 10 * N * D,
        transcendentals=N * FF,
        bytes_accessed=(N * D * (xsz + osz)
                        + n_row_tiles * 2 * D * FF * wsz    # weights streamed per row tile
                        + (3 * D + FF) * 4),
    )

    # 1-D params as lane-dense 2-D tiles
    gamma2 = gamma.reshape(1, D)
    beta2 = beta.reshape(1, D)
    b1_2 = b1.reshape(1, FF)
    b2_2 = b2.reshape(1, D)

    scratch = [pltpu.VMEM((tm, D), y_dtype)]                  # y = LN(x), matmul dtype
    if not acc_in_out:
        scratch.append(pltpu.VMEM((tm, D), jnp.float32))      # f32 accumulator

    out2 = pl.pallas_call(
        functools.partial(ff_kernel, acc_in_out=acc_in_out),
        out_shape=jax.ShapeDtypeStruct((N, D), x.dtype),
        grid_spec=pltpu.PrefetchScalarGridSpec(
            num_scalar_prefetch=0,
            grid=grid,
            in_specs=[
                pl.BlockSpec((tm, D), lambda i, k: (i, 0)),     # x rows
                pl.BlockSpec((1, D), lambda i, k: (0, 0)),      # gamma
                pl.BlockSpec((1, D), lambda i, k: (0, 0)),      # beta
                pl.BlockSpec((D, tff), lambda i, k: (0, k)),    # w1 slice
                pl.BlockSpec((1, tff), lambda i, k: (0, k)),    # b1 slice
                pl.BlockSpec((tff, D), lambda i, k: (k, 0)),    # w2 slice
                pl.BlockSpec((1, D), lambda i, k: (0, 0)),      # b2
            ],
            out_specs=pl.BlockSpec((tm, D), lambda i, k: (i, 0)),
            scratch_shapes=scratch,
        ),
        compiler_params=pltpu.CompilerParams(
            dimension_semantics=("parallel", "arbitrary"),
            vmem_limit_bytes=vmem_limit,
        ),
        cost_estimate=cost,
    )(x2, gamma2, beta2, w1, b1_2, w2, b2_2)

    return out2.reshape(B, S, D)


def init_params(key, patch_dim, ff_dim, dtype=jnp.float32):
    """Deterministic synthetic parameters with PyTorch-like shapes/semantics."""
    k1, k2, k3, k4 = jax.random.split(key, 4)
    gamma = jnp.ones((patch_dim,), dtype)       # LayerNorm default init
    beta = jnp.zeros((patch_dim,), dtype)
    lim1 = 1.0 / (patch_dim ** 0.5)
    w1 = jax.random.uniform(k1, (patch_dim, ff_dim), dtype, -lim1, lim1)
    b1 = jax.random.uniform(k2, (ff_dim,), dtype, -lim1, lim1)
    lim2 = 1.0 / (ff_dim ** 0.5)
    w2 = jax.random.uniform(k3, (ff_dim, patch_dim), dtype, -lim2, lim2)
    b2 = jax.random.uniform(k4, (patch_dim,), dtype, -lim2, lim2)
    return gamma, beta, w1, b1, w2, b2


def ff_reference(x, gamma, beta, w1, b1, w2, b2):
    """Pure-JAX reference (eval-mode dropout) for sanity checking."""
    xf = x.astype(jnp.float32)
    mean = jnp.mean(xf, axis=-1, keepdims=True)
    var = jnp.mean(jnp.square(xf - mean), axis=-1, keepdims=True)
    y = (xf - mean) * lax.rsqrt(var + 1e-5) * gamma + beta
    h = y @ w1 + b1
    h = 0.5 * h * (1.0 + lax.erf(h * _INV_SQRT2))
    return (h @ w2 + b2).astype(x.dtype)


if __name__ == "__main__":
    B, S, patch_dim, ff_dim = 2, 8, 32, 64

    key = jax.random.PRNGKey(0)
    kx, kp = jax.random.split(key)
    x = jax.random.normal(kx, (B, S, patch_dim), jnp.float32)
    params = init_params(kp, patch_dim, ff_dim)

    out = jax.block_until_ready(ff_forward(x, *params))
    ref = ff_reference(x, *params)
    assert out.shape == (B, S, patch_dim)
    assert jnp.allclose(out, ref, atol=2e-5, rtol=2e-5), "mismatch vs. reference"

    # non-divisible row count -> partial final row block (no host-side padding copy)
    x_odd = jax.random.normal(kx, (3, 5, patch_dim), jnp.float32)
    out_odd = jax.block_until_ready(ff_forward(x_odd, *params, tile_rows=8))
    assert jnp.allclose(out_odd, ff_reference(x_odd, *params), atol=2e-5, rtol=2e-5)

    # bf16 weights + activations (inference fast path: bf16 MXU, bf16 LN scratch,
    # f32 accumulator scratch since the output is bf16)
    xb = x.astype(jnp.bfloat16)
    params_b = tuple(p.astype(jnp.bfloat16) for p in params)
    out_b = jax.block_until_ready(ff_forward(xb, *params_b))
    assert jnp.allclose(out_b.astype(jnp.float32), ref, atol=1e-1, rtol=1e-1)

    print("KERNEL_OK")
</pallas_src>

<mosaic_0001>
module attributes {stable_mosaic.version = 11 : i64} {
  func.func @ff_kernel(%arg0: i32, %arg1: i32, %arg2: memref<16x32xf32, #tpu.memory_space<vmem>>, %arg3: memref<1x32xf32, #tpu.memory_space<vmem>>, %arg4: memref<1x32xf32, #tpu.memory_space<vmem>>, %arg5: memref<32x64xf32, #tpu.memory_space<vmem>>, %arg6: memref<1x64xf32, #tpu.memory_space<vmem>>, %arg7: memref<64x32xf32, #tpu.memory_space<vmem>>, %arg8: memref<1x32xf32, #tpu.memory_space<vmem>>, %arg9: memref<16x32xf32, #tpu.memory_space<vmem>>, %arg10: memref<16x32xf32, #tpu.memory_space<vmem>>) attributes {dimension_semantics = [#tpu.dimension_semantics<parallel>, #tpu.dimension_semantics<arbitrary>], iteration_bounds = array<i64: 1, 1>, scalar_prefetch = 0 : i64, scratch_operands = 1 : i64, tpu.core_type = #tpu.core_type<tc>, window_params = [{transform_indices = @transform_0, window_bounds = array<i64: 16, 32>}, {pipeline_mode = #tpu.pipeline_mode<synchronous>, transform_indices = @transform_1, window_bounds = array<i64: 1, 32>}, {pipeline_mode = #tpu.pipeline_mode<synchronous>, transform_indices = @transform_2, window_bounds = array<i64: 1, 32>}, {transform_indices = @transform_3, window_bounds = array<i64: 32, 64>}, {transform_indices = @transform_4, window_bounds = array<i64: 1, 64>}, {transform_indices = @transform_5, window_bounds = array<i64: 64, 32>}, {pipeline_mode = #tpu.pipeline_mode<synchronous>, transform_indices = @transform_6, window_bounds = array<i64: 1, 32>}, {transform_indices = @transform_7, window_bounds = array<i64: 16, 32>}]} {
    %c0_i32 = arith.constant 0 : i32
    %0 = arith.cmpi eq, %arg1, %c0_i32 : i32
    %1 = arith.extui %0 : i1 to i32
    %c0_i32_0 = arith.constant 0 : i32
    %2 = arith.cmpi ne, %1, %c0_i32_0 : i32
    scf.if %2 {
      %c0_18 = arith.constant 0 : index
      %c0_19 = arith.constant 0 : index
      %25 = vector.load %arg2[%c0_18, %c0_19] : memref<16x32xf32, #tpu.memory_space<vmem>>, vector<16x32xf32>
      %cst_20 = arith.constant dense<0.000000e+00> : vector<16xf32>
      %26 = vector.multi_reduction <add>, %25, %cst_20 [1] : vector<16x32xf32> to vector<16xf32>
      %27 = vector.shape_cast %26 : vector<16xf32> to vector<16x1xf32>
      %cst_21 = arith.constant 3.200000e+01 : f32
      %28 = vector.broadcast %cst_21 : f32 to vector<16x1xf32>
      %29 = arith.divf %27, %28 : vector<16x1xf32>
      %30 = vector.broadcast %29 : vector<16x1xf32> to vector<16x32xf32>
      %31 = arith.subf %25, %30 : vector<16x32xf32>
      %32 = arith.mulf %31, %31 : vector<16x32xf32>
      %cst_22 = arith.constant dense<0.000000e+00> : vector<16xf32>
      %33 = vector.multi_reduction <add>, %32, %cst_22 [1] : vector<16x32xf32> to vector<16xf32>
      %34 = vector.shape_cast %33 : vector<16xf32> to vector<16x1xf32>
      %cst_23 = arith.constant 3.200000e+01 : f32
      %35 = vector.broadcast %cst_23 : f32 to vector<16x1xf32>
      %36 = arith.divf %34, %35 : vector<16x1xf32>
      %37 = vector.broadcast %29 : vector<16x1xf32> to vector<16x32xf32>
      %38 = arith.subf %25, %37 : vector<16x32xf32>
      %cst_24 = arith.constant 9.99999974E-6 : f32
      %39 = vector.broadcast %cst_24 : f32 to vector<16x1xf32>
      %40 = arith.addf %36, %39 : vector<16x1xf32>
      %41 = math.rsqrt %40 : vector<16x1xf32>
      %42 = vector.broadcast %41 : vector<16x1xf32> to vector<16x32xf32>
      %43 = arith.mulf %38, %42 : vector<16x32xf32>
      %c0_25 = arith.constant 0 : index
      %c0_26 = arith.constant 0 : index
      %44 = vector.load %arg3[%c0_25, %c0_26] : memref<1x32xf32, #tpu.memory_space<vmem>>, vector<1x32xf32>
      %45 = vector.broadcast %44 : vector<1x32xf32> to vector<16x32xf32>
      %46 = arith.mulf %43, %45 : vector<16x32xf32>
      %c0_27 = arith.constant 0 : index
      %c0_28 = arith.constant 0 : index
      %47 = vector.load %arg4[%c0_27, %c0_28] : memref<1x32xf32, #tpu.memory_space<vmem>>, vector<1x32xf32>
      %48 = vector.broadcast %47 : vector<1x32xf32> to vector<16x32xf32>
      %49 = arith.addf %46, %48 : vector<16x32xf32>
      %c0_29 = arith.constant 0 : index
      %c0_30 = arith.constant 0 : index
      %50 = vector.load %arg10[%c0_29, %c0_30] : memref<16x32xf32, #tpu.memory_space<vmem>>, vector<16x32xf32>
      tpu.vector_store %arg10[%c0_29, %c0_30], %49 {strides = array<i32>} : memref<16x32xf32, #tpu.memory_space<vmem>>, vector<16x32xf32>,
      %cst_31 = arith.constant 0.000000e+00 : f32
      %51 = vector.broadcast %cst_31 : f32 to vector<16x32xf32>
      %c0_32 = arith.constant 0 : index
      %c0_33 = arith.constant 0 : index
      %52 = vector.load %arg9[%c0_32, %c0_33] : memref<16x32xf32, #tpu.memory_space<vmem>>, vector<16x32xf32>
      tpu.vector_store %arg9[%c0_32, %c0_33], %51 {strides = array<i32>} : memref<16x32xf32, #tpu.memory_space<vmem>>, vector<16x32xf32>,
    } else {
    }
    %c0 = arith.constant 0 : index
    %c0_1 = arith.constant 0 : index
    %3 = vector.load %arg5[%c0, %c0_1] : memref<32x64xf32, #tpu.memory_space<vmem>>, vector<32x64xf32>
    %c0_2 = arith.constant 0 : index
    %c0_3 = arith.constant 0 : index
    %4 = vector.load %arg10[%c0_2, %c0_3] : memref<16x32xf32, #tpu.memory_space<vmem>>, vector<16x32xf32>
    %cst = arith.constant dense<0.000000e+00> : vector<16x64xf32>
    %5 = tpu.matmul %4, %3, %cst {dimension_numbers = #tpu.dot_dimension_numbers<[1], [0], [0], [1], [0, 0, 1, 1], [], []>} : vector<16x32xf32>, vector<32x64xf32>, vector<16x64xf32> -> vector<16x64xf32>
    %c0_4 = arith.constant 0 : index
    %c0_5 = arith.constant 0 : index
    %6 = vector.load %arg6[%c0_4, %c0_5] : memref<1x64xf32, #tpu.memory_space<vmem>>, vector<1x64xf32>
    %7 = vector.broadcast %6 : vector<1x64xf32> to vector<16x64xf32>
    %8 = arith.addf %5, %7 : vector<16x64xf32>
    %cst_6 = arith.constant 5.000000e-01 : f32
    %9 = vector.broadcast %cst_6 : f32 to vector<16x64xf32>
    %10 = arith.mulf %9, %8 : vector<16x64xf32>
    %cst_7 = arith.constant 0.707106769 : f32
    %11 = vector.broadcast %cst_7 : f32 to vector<16x64xf32>
    %12 = arith.mulf %8, %11 : vector<16x64xf32>
    %13 = math.erf %12 : vector<16x64xf32>
    %cst_8 = arith.constant 1.000000e+00 : f32
    %14 = vector.broadcast %cst_8 : f32 to vector<16x64xf32>
    %15 = arith.addf %14, %13 : vector<16x64xf32>
    %16 = arith.mulf %10, %15 : vector<16x64xf32>
    %c0_9 = arith.constant 0 : index
    %c0_10 = arith.constant 0 : index
    %17 = vector.load %arg7[%c0_9, %c0_10] : memref<64x32xf32, #tpu.memory_space<vmem>>, vector<64x32xf32>
    %c0_11 = arith.constant 0 : index
    %c0_12 = arith.constant 0 : index
    %18 = vector.load %arg9[%c0_11, %c0_12] : memref<16x32xf32, #tpu.memory_space<vmem>>, vector<16x32xf32>
    %cst_13 = arith.constant dense<0.000000e+00> : vector<16x32xf32>
    %19 = tpu.matmul %16, %17, %cst_13 {dimension_numbers = #tpu.dot_dimension_numbers<[1], [0], [0], [1], [0, 0, 1, 1], [], []>} : vector<16x64xf32>, vector<64x32xf32>, vector<16x32xf32> -> vector<16x32xf32>
    %20 = arith.addf %18, %19 : vector<16x32xf32>
    %c0_14 = arith.constant 0 : index
    %c0_15 = arith.constant 0 : index
    %21 = vector.load %arg9[%c0_14, %c0_15] : memref<16x32xf32, #tpu.memory_space<vmem>>, vector<16x32xf32>
    tpu.vector_store %arg9[%c0_14, %c0_15], %20 {strides = array<i32>} : memref<16x32xf32, #tpu.memory_space<vmem>>, vector<16x32xf32>,
    %c0_i32_16 = arith.constant 0 : i32
    %22 = arith.cmpi eq, %arg1, %c0_i32_16 : i32
    %23 = arith.extui %22 : i1 to i32
    %c0_i32_17 = arith.constant 0 : i32
    %24 = arith.cmpi ne, %23, %c0_i32_17 : i32
    scf.if %24 {
      %c0_18 = arith.constant 0 : index
      %c0_19 = arith.constant 0 : index
      %25 = vector.load %arg9[%c0_18, %c0_19] : memref<16x32xf32, #tpu.memory_space<vmem>>, vector<16x32xf32>
      %c0_20 = arith.constant 0 : index
      %c0_21 = arith.constant 0 : index
      %26 = vector.load %arg8[%c0_20, %c0_21] : memref<1x32xf32, #tpu.memory_space<vmem>>, vector<1x32xf32>
      %27 = vector.broadcast %26 : vector<1x32xf32> to vector<16x32xf32>
      %28 = arith.addf %25, %27 : vector<16x32xf32>
      %c0_22 = arith.constant 0 : index
      %c0_23 = arith.constant 0 : index
      %29 = vector.load %arg9[%c0_22, %c0_23] : memref<16x32xf32, #tpu.memory_space<vmem>>, vector<16x32xf32>
      tpu.vector_store %arg9[%c0_22, %c0_23], %28 {strides = array<i32>} : memref<16x32xf32, #tpu.memory_space<vmem>>, vector<16x32xf32>,
    } else {
    }
    return
  }
  func.func @transform_0(%arg0: i32, %arg1: i32) -> (i32, i32) {
    %c0_i32 = arith.constant 0 : i32
    %c0_i32_0 = arith.constant 0 : i32
    return %arg0, %c0_i32 : i32, i32
  }
  func.func @transform_1(%arg0: i32, %arg1: i32) -> (i32, i32) {
    %c0_i32 = arith.constant 0 : i32
    %c0_i32_0 = arith.constant 0 : i32
    %c0_i32_1 = arith.constant 0 : i32
    return %c0_i32, %c0_i32_0 : i32, i32
  }
  func.func @transform_2(%arg0: i32, %arg1: i32) -> (i32, i32) {
    %c0_i32 = arith.constant 0 : i32
    %c0_i32_0 = arith.constant 0 : i32
    %c0_i32_1 = arith.constant 0 : i32
    return %c0_i32, %c0_i32_0 : i32, i32
  }
  func.func @transform_3(%arg0: i32, %arg1: i32) -> (i32, i32) {
    %c0_i32 = arith.constant 0 : i32
    %c0_i32_0 = arith.constant 0 : i32
    return %c0_i32, %arg1 : i32, i32
  }
  func.func @transform_4(%arg0: i32, %arg1: i32) -> (i32, i32) {
    %c0_i32 = arith.constant 0 : i32
    %c0_i32_0 = arith.constant 0 : i32
    return %c0_i32, %arg1 : i32, i32
  }
  func.func @transform_5(%arg0: i32, %arg1: i32) -> (i32, i32) {
    %c0_i32 = arith.constant 0 : i32
    %c0_i32_0 = arith.constant 0 : i32
    return %arg1, %c0_i32 : i32, i32
  }
  func.func @transform_6(%arg0: i32, %arg1: i32) -> (i32, i32) {
    %c0_i32 = arith.constant 0 : i32
    %c0_i32_0 = arith.constant 0 : i32
    %c0_i32_1 = arith.constant 0 : i32
    return %c0_i32, %c0_i32_0 : i32, i32
  }
  func.func @transform_7(%arg0: i32, %arg1: i32) -> (i32, i32) {
    %c0_i32 = arith.constant 0 : i32
    %c0_i32_0 = arith.constant 0 : i32
    return %arg0, %c0_i32 : i32, i32
  }
}

</mosaic_0001>

<bundles_post_ra>
// kernel: ff_forward.1
= control target key start
LH: loop header
LB: loop body
LE: loop exit
PB: predicated region body
PF: predicated region fallthrough
CT: control target
= control target key end

     0   :  { %vm33_vm0 = vcmask 261120   ;;  %s554_s0 = inlined_call_operand.vmem [shape: f32[16,32], index: 0, kind: input, shape index: {}]   ;;  %s555_s1 = inlined_call_operand.vmem [shape: f32[1,32], index: 1, kind: input, shape index: {}]   ;;  %s556_s2 = inlined_call_operand.vmem [shape: f32[1,32], index: 2, kind: input, shape index: {}]   ;;  %s557_s3 = inlined_call_operand.vmem [shape: f32[32,64], index: 3, kind: input, shape index: {}]   ;;  %s558_s4 = inlined_call_operand.vmem [shape: f32[1,64], index: 4, kind: input, shape index: {}]   ;;  %s559_s5 = inlined_call_operand.vmem [shape: f32[64,32], index: 5, kind: input, shape index: {}]   ;;  %s560_s6 = inlined_call_operand.vmem [shape: f32[1,32], index: 6, kind: input, shape index: {}]   ;;  %s561_s7 = inlined_call_operand.hbm [shape: f32[16,32], index: 7, kind: output, shape index: {}]  }
   0x1   :  { %v31_v0 = vld [vmem:[%s554_s0] sm:$0xff]  ;;  %v32_v1 = vld [vmem:[%s554_s0 + $0x8] sm:$0xff] }
   0x2   :  { %12 = vsyncpa [#allocation4], 0  ;;  %v34_v2 = vsel %vm33_vm0, %v31_v0, 0.0  ;;  %v37_v3 = vsel %vm33_vm0, %v32_v1, 0.0  ;;  %v83_v14 = vld [vmem:[%s557_s3] sm:$0xff]  ;;  %v84_v15 = vld [vmem:[%s557_s3 + $0x8] sm:$0xff] }
   0x3   :  { %35 = vadd.xlane.f32.xlu0 %v34_v2  ;;  %v370_v16 = vpack.c.bf16 %v84_v15, %v83_v14  ;;  %v85_v17 = vld [vmem:[%s557_s3 + $0x10] sm:$0xff]  ;;  %v86_v18 = vld [vmem:[%s557_s3 + $0x18] sm:$0xff]  ;;  %v316_v27 = vld [vmem:[%s555_s1] ss:$0 sm:$0xff]  ;;  %v430_v50 = vmov 0.0   ;;  %vm198_vm1 = vcmask 523264  }
   0x4   :  { %v374_v19 = vpack.c.bf16 %v86_v18, %v85_v17  ;;  %v317_v29 = vld [vmem:[%s556_s2] ss:$0 sm:$0xff]  ;;  %v189_v39 = vld [vmem:[%s559_s5 + $0x8] sm:$0xff]  ;;  %v190_v41 = vld [vmem:[%s559_s5 + $0x10] sm:$0xff]  ;;  %82 = vst.msk [vmem:[#allocation3 + $0x8] sm:$0xff] %vm33_vm0, %v430_v50  ;;  %s431_s30 = smov [#allocation3]  }
   0x5   :  { %371 = vmatprep.subr.bf16.mxu0 %v370_v16  ;;  %v188_v38 = vld [vmem:[%s559_s5] sm:$0xff]  ;;  %v191_v42 = vld [vmem:[%s559_s5 + $0x18] sm:$0xff]  ;;  %v193_v45 = vld [vmem:[%s559_s5 + $0x28] sm:$0xff]  ;;  %81 = vst.msk [vmem:[#allocation3] sm:$0xff] %vm33_vm0, %v430_v50  ;;  %s305_s8 = sshll.u32 %s431_s30, 4  ;;  %s306_s8 = int_to_ptr.vmem [resolvable:$true] %s305_s8 }
   0x6   :  { %373 = vmatpush3.bf16.msra.mxu0 %v370_v16  ;;  %v378_v40 = vpack.c.bf16 %v189_v39, %v188_v38  ;;  %v382_v43 = vpack.c.bf16 %v191_v42, %v190_v41  ;;  %v192_v44 = vld [vmem:[%s559_s5 + $0x20] sm:$0xff]  ;;  %v194_v47 = vld [vmem:[%s559_s5 + $0x30] sm:$0xff]  ;;  %v195_v48 = vld [vmem:[%s559_s5 + $0x38] sm:$0xff]  ;;  %s406_s9 = scalar_lea.vmem %s306_s8, 256  ;;  %p411_p1 = scmp.lt.s32.totalorder %s306_s8, %s306_s8 }
   0x7   :  { %38 = vadd.xlane.f32.xlu0 %v37_v3  ;;  %375 = vmatprep.subr.bf16.mxu0 %v374_v19  ;;  %v386_v46 = vpack.c.bf16 %v193_v45, %v192_v44  ;;  %v390_v49 = vpack.c.bf16 %v195_v48, %v194_v47  ;;  %v318_v51 = vld [vmem:[%s558_s4] ss:$0 sm:$0xff]  ;;  %p407_p0 = scmp.ne.s32.totalorder %s306_s8, %s406_s9  ;;  %p412_p2 = scmp.lt.s32.totalorder %s406_s9, %s406_s9 }
   0x8   :  { %379 = vmatprep.subr.bf16.mxu1 %v378_v40 }
   0x9   :  { %381 = vmatpush3.bf16.msra.mxu1 %v378_v40  ;;  %p413_p3 = por %p412_p2, %p411_p1 }
   0xa   :  { %377 = vmatpush3.bf16.msra.mxu0 %v374_v19  ;;  %383 = vmatprep.subr.bf16.mxu1 %v382_v43 }
   0xb   :  { %v197_v2 = vld [vmem:[#allocation3 + $0x8] sm:$0xff]  ;;  %p414_p4 = pnand %p413_p3, %p407_p0 }
   0xc   :  { %v196_v3 = vld [vmem:[#allocation3] sm:$0xff] }
   0xd   :  { %385 = vmatpush3.bf16.msra.mxu1 %v382_v43 }
   0xe   :  { %387 = vmatprep.subr.bf16.mxu1 %v386_v46 }
  0x11   :  { %389 = vmatpush3.bf16.msra.mxu1 %v386_v46 }
  0x12   :  { %391 = vmatprep.subr.bf16.mxu1 %v390_v49 }
  0x15   :  { %393 = vmatpush3.bf16.msra.mxu1 %v390_v49 }
  0x90   :  { %v36_v4 = vpop.xlane.xlu0 %35 }
  0x91   :  { %v41_v5 = vmul.f32 0.03125, %v36_v4 }
  0x93   :  { %v43_v6 = vsub.f32 %v31_v0, %v41_v5 }
  0x94   :  { %v39_v7 = vpop.xlane.xlu0 %38 }
  0x95   :  { %v42_v8 = vmul.f32 0.03125, %v39_v7  ;;  %v45_v9 = vmul.f32 %v43_v6, %v43_v6 }
  0x97   :  { %v44_v10 = vsub.f32 %v32_v1, %v42_v8  ;;  %v47_v11 = vsel %vm33_vm0, %v45_v9, 0.0  ;;  %v323_v8 = vld [vmem:[%s560_s6] ss:$0 sm:$0xff] }
  0x98   :  { %48 = vadd.xlane.f32.xlu1 %v47_v11 }
  0x99   :  { %v46_v12 = vmul.f32 %v44_v10, %v44_v10 }
  0x9b   :  { %v50_v13 = vsel %vm33_vm0, %v46_v12, 0.0 }
  0x9c   :  { %51 = vadd.xlane.f32.xlu1 %v50_v13 }
 0x125   :  { %v49_v20 = vpop.xlane.xlu1 %48 }
 0x126   :  { %v53_v21 = vmul.f32 0.03125, %v49_v20 }
 0x128   :  { %v55_v22 = vadd.f32 1e-05, %v53_v21 }
 0x129   :  { %v52_v23 = vpop.xlane.xlu1 %51 }
 0x12a   :  { %398 = vrsqrt.f32 %v55_v22  ;;  %v54_v24 = vmul.f32 0.03125, %v52_v23 }
 0x12c   :  { %v56_v25 = vadd.f32 1e-05, %v54_v24 }
 0x12e   :  { %400 = vrsqrt.f32 %v56_v25 }
 0x134   :  { %v399_v26 = vpop.eup %398 }
 0x135   :  { %v59_v28 = vmul.f32 %v399_v26, %v43_v6 }
 0x137   :  { %v68_v30 = vmul.f32 %v316_v27, %v59_v28 }
 0x138   :  { %v401_v31 = vpop.eup %400 }
 0x139   :  { %v77_v32 = vadd.f32 %v317_v29, %v68_v30  ;;  %v60_v33 = vmul.f32 %v401_v31, %v44_v10 }
 0x13b   :  { %79 = vst.msk [vmem:[#allocation2] sm:$0xff] %vm33_vm0, %v77_v32  ;;  %v69_v34 = vmul.f32 %v316_v27, %v60_v33 }
 0x13d   :  { %v78_v35 = vadd.f32 %v317_v29, %v69_v34 }
 0x13f   :  { %80 = vst.msk [vmem:[#allocation2 + $0x8] sm:$0xff] %vm33_vm0, %v78_v35 }
 0x142   :  { %v87_v36 = vld [vmem:[#allocation2] sm:$0xff] }
 0x143   :  { %348 = vmatprep.mubr.msk.f32.mxu0 %vm33_vm0, %v87_v36 }
 0x146   :  { %v88_v37 = vld [vmem:[#allocation2 + $0x8] sm:$0xff] }
 0x147   :  { %349 = vmatmul.mubr.msk.f32.vlgmr.msra.gmra.mrb[0].mxu0 %vm33_vm0, %v88_v37 }
 0x21a   :  { %v350_v52 = vpop.f32.mrb[0].mxu0 }
 0x21b   :  { %v175_v53 = vadd.f32 %v350_v52, %v318_v51  ;;  %v169_v54 = vpop.f32.mrb[1].mxu0 }
 0x21c   :  { %v170_v55 = vadd.f32 %v318_v51, %v169_v54 }
 0x21d   :  { %v181_v56 = vmul.f32 0.70710677, %v175_v53  ;;  %v179_v63 = vmul.f32 0.5, %v175_v53 }
 0x21e   :  { %v180_v57 = vmul.f32 0.70710677, %v170_v55  ;;  %v178_v61 = vmul.f32 0.5, %v170_v55 }
 0x21f   :  { %402 = verf.f32 %v181_v56 }
 0x220   :  { %404 = verf.f32 %v180_v57 }
 0x229   :  { %v403_v58 = vpop.eup %402 }
 0x22a   :  { %v405_v59 = vpop.eup %404  ;;  %v185_v60 = vadd.f32 1.0, %v403_v58 }
 0x22b   :  { %v184_v62 = vadd.f32 1.0, %v405_v59 }
 0x22c   :  { %v187_v1 = vmul.f32 %v185_v60, %v179_v63 }
 0x22d   :  { %v186_v0 = vmul.f32 %v184_v62, %v178_v61 }
 0x22f   :  { %367 = vmatprep.mubr.msk.f32.mxu1 %vm198_vm1, %v186_v0 }
 0x230   :  { %368 = vmatmul.mubr.msk.f32.vlgmr.msra.gmra.mrb[0].mxu1 %vm198_vm1, %v187_v1 }
 0x303   :  { %v369_v4 = vpop.f32.mrb[0].mxu1 }
 0x304   :  { %v281_v5 = vadd.f32 %v369_v4, %v197_v2  ;;  %v271_v6 = vpop.f32.mrb[1].mxu1 }
 0x305   :  { %v280_v7 = vadd.f32 %v271_v6, %v196_v3 }
 0x306   :  { %283 = vst.msk [vmem:[#allocation3 + $0x8] sm:$0xff] %vm33_vm0, %v281_v5 }
 0x307   :  { %282 = vst.msk [vmem:[#allocation3] sm:$0xff] %vm33_vm0, %v280_v7 }
 0x30d   :  { %v288_v9 = vld [vmem:[#allocation3 + $0x8] sm:$0xff] }
 0x30e   :  { %v287_v10 = vld [vmem:[#allocation3] sm:$0xff]  ;;  %v297_v11 = vadd.f32 %v323_v8, %v288_v9 }
 0x30f   :  { %v296_v12 = vadd.f32 %v323_v8, %v287_v10 }
 0x310   :  { %299 = vst.msk [vmem:[#allocation3 + $0x8] sm:$0xff] %vm33_vm0, %v297_v11 }
 0x311   :  { %298 = vst.msk [vmem:[#allocation3] sm:$0xff] %vm33_vm0, %v296_v12 }
 0x312   :  { %417 = shalt.err (!%p414_p4)
}
 0x313   :  { %s418_s11 = scalar_lea.hbm %s561_s7, 256 }
 0x314   :  { %p419_p5 = scmp.ne.s32.totalorder %s561_s7, %s418_s11  ;;  %p422_p6 = scmp.lt.u32.totalorder %s418_s11, %s561_s7 }
 0x316   :  { %p424_p7 = pnand %p422_p6, %p419_p5 }
 0x318   :  { %427 = shalt.err (!%p424_p7)
}
 0x319   :  { %s432_s1 = smov 128   ;;  %s433_s15 = smov 8  }
 0x31a   :  { %311 = dma.vmem_to_hbm [thread:$0]  %s306_s8, 256, %s561_s7, [#allocation4], %s432_s1, %s432_s1, %s433_s15  }
 0x31b   :  { %428 = dma.done.wait [#allocation4], 256  }
 0x31c   :  { %429 = vsyncadd [#allocation4], 4294967040 }
 0x31d   :  { %315 = vsyncpa [#allocation4], 1 }

</bundles_post_ra>
